<compile_context>
chip_gen: v7x
topology: tpu7x:2x2x1
jax: 0.10.0
libtpu: 0.0.40
codegen_flags: <defaults>
</compile_context>

<pallas_src>
import functools

import jax
import jax.numpy as jnp
from jax.experimental import pallas as pl
from jax.experimental.pallas import tpu as pltpu

BIG_NEGATIVE = -1.0e6  # graphinvent's constants.big_negative


def _round_up(x, m):
    return (x + m - 1) // m * m


# ----------------------------------------------------------------------------
# Pallas kernel
# ----------------------------------------------------------------------------
def set2vec_kernel(cat_ref,     # [B*N, F1p]  concat(hidden, input, ones, zero-pad)
                   emask_ref,   # [B, B*N]    node mask + cross-batch mask (* -1e6)
                   params_ref,  # [P, 4M]     lane-dense packed parameter slab
                   out_ref,     # [B, 2M]     lanes 0:M = query, M:2M = read
                   *, lstm_computations, memory_size, feat_pad, w_off, b_off):
    M = memory_size
    B = emask_ref.shape[0]

    # ---- hoisted invariant loads (once, reused across unrolled iterations) --
    w_emb = params_ref[0:feat_pad, 0:M]                # [F1p, M]
    w_gates = params_ref[w_off:w_off + 2 * M, :]       # [2M, 4M]  = [W_ih; W_hh]
    b_gates = params_ref[b_off:b_off + 1, :]           # [1, 4M]   = b_ih + b_hh
    emask = emask_ref[...]                             # [B, B*N]

    # ---- embedding: memory lives in vregs; transpose hoisted once -----------
    memory = jnp.dot(cat_ref[...], w_emb,
                     preferred_element_type=jnp.float32)   # [B*N, M]
    memory_t = memory.T                                     # [M, B*N]

    # ---- LSTMCell recurrence + masked attention (static unroll) -------------
    h = jnp.zeros((B, M), jnp.float32)        # hidden_state
    c = jnp.zeros((B, M), jnp.float32)        # cell_state
    x = jnp.zeros((B, M), jnp.float32)        # lstm_input
    query = h
    read = x
    for _ in range(lstm_computations):
        # one fused, fully lane-dense gate matmul per step (PyTorch gate order i,f,g,o)
        xh = jnp.concatenate([x, h], axis=1)                             # [B, 2M]
        gates = jnp.dot(xh, w_gates,
                        preferred_element_type=jnp.float32) + b_gates    # [B, 4M]
        i_g = jax.nn.sigmoid(gates[:, 0 * M:1 * M])
        f_g = jax.nn.sigmoid(gates[:, 1 * M:2 * M])
        g_g = jnp.tanh(gates[:, 2 * M:3 * M])
        o_g = jax.nn.sigmoid(gates[:, 3 * M:4 * M])
        c = f_g * c + i_g * g_g
        query = o_g * jnp.tanh(c)                                        # [B, M]

        # batch-flattened attention: two plain matmuls + 16-lane softmax row.
        # Mask (incl. cross-batch -1e6) added BEFORE the max subtraction.
        e = jnp.dot(query, memory_t,
                    preferred_element_type=jnp.float32) + emask          # [B, B*N]
        e = e - jnp.max(e, axis=-1, keepdims=True)
        p = jnp.exp(e)
        att = p / jnp.sum(p, axis=-1, keepdims=True)                     # [B, B*N]
        read = jnp.dot(att, memory,
                       preferred_element_type=jnp.float32)               # [B, M]

        h = query
        x = read

    # single output block: query | read in one store
    out_ref[...] = jnp.concatenate([query, read], axis=1)                # [B, 2M]


# ----------------------------------------------------------------------------
# Parameter packing (wrapper-side; one lane-dense [rows, 4M] slab)
# ----------------------------------------------------------------------------
def pack_params(params, in_features, memory_size):
    M = memory_size
    F1 = in_features + 1                      # +1 for the ones column (bias fold)
    F1p = _round_up(F1, 8)                    # sublane-aligned embedding K
    w_off = F1p                               # fused gate-weight block start
    b_off = w_off + 2 * M                     # combined bias row
    total_rows = _round_up(b_off + 1, 8)

    slab = jnp.zeros((total_rows, 4 * M), jnp.float32)
    w_emb_aug = jnp.concatenate([params["w_emb"].astype(jnp.float32),
                                 params["b_emb"].astype(jnp.float32)], axis=0)
    slab = slab.at[0:F1, 0:M].set(w_emb_aug)                     # [F1, M] in lanes 0:M
    slab = slab.at[w_off:w_off + M, :].set(
        params["w_ih"].astype(jnp.float32))                      # [M, 4M]
    slab = slab.at[w_off + M:w_off + 2 * M, :].set(
        params["w_hh"].astype(jnp.float32))                      # [M, 4M]
    bias = (params["b_ih"][0] + params["b_hh"][0]).astype(jnp.float32)   # [4M]
    slab = slab.at[b_off, :].set(bias)
    return slab, F1p, w_off, b_off


# ----------------------------------------------------------------------------
# Wrapper
# ----------------------------------------------------------------------------
def set2vec_forward(hidden_output_nodes, input_nodes, node_mask, params,
                    *, lstm_computations, memory_size):
    B, N, _ = input_nodes.shape
    F = hidden_output_nodes.shape[-1] + input_nodes.shape[-1]
    F1 = F + 1
    F1p = _round_up(F1, 8)
    M = memory_size
    BN = B * N

    # cat + ones column (folds embedding bias into the matmul) + zero pad to F1p
    cat_aug = jnp.concatenate(
        [hidden_output_nodes.astype(jnp.float32),
         input_nodes.astype(jnp.float32),
         jnp.ones((B, N, 1), jnp.float32),
         jnp.zeros((B, N, F1p - F1), jnp.float32)], axis=2).reshape(BN, F1p)

    # [B, B*N] energy mask: kills padded nodes AND cross-batch columns
    col_batch = jnp.repeat(jnp.arange(B), N)                          # [B*N]
    same_batch = jnp.arange(B)[:, None] == col_batch[None, :]         # [B, B*N]
    valid = same_batch & node_mask.reshape(1, BN)                     # [B, B*N]
    emask = (1.0 - valid.astype(jnp.float32)) * BIG_NEGATIVE

    slab, feat_pad, w_off, b_off = pack_params(params, F, M)

    kernel = functools.partial(
        set2vec_kernel,
        lstm_computations=lstm_computations, memory_size=M,
        feat_pad=feat_pad, w_off=w_off, b_off=b_off)

    vmem = pl.BlockSpec(memory_space=pltpu.MemorySpace.VMEM)
    out = pl.pallas_call(
        kernel,
        out_shape=jax.ShapeDtypeStruct((B, 2 * M), jnp.float32),
        in_specs=[vmem, vmem, vmem],
        out_specs=vmem,
    )(cat_aug, emask, slab)
    return out                                                        # [B, 2M]


# ----------------------------------------------------------------------------
# Pure-JAX reference (mirrors the PyTorch forward exactly)
# ----------------------------------------------------------------------------
def set2vec_reference(hidden_output_nodes, input_nodes, node_mask, params,
                      *, lstm_computations, memory_size):
    B = input_nodes.shape[0]
    M = memory_size
    energy_mask = (1.0 - node_mask.astype(jnp.float32)) * BIG_NEGATIVE
    cat = jnp.concatenate([hidden_output_nodes, input_nodes], axis=2)
    memory = jnp.einsum("bnf,fm->bnm", cat, params["w_emb"]) + params["b_emb"][0]

    h = jnp.zeros((B, M), jnp.float32)
    c = jnp.zeros((B, M), jnp.float32)
    x = jnp.zeros((B, M), jnp.float32)
    for _ in range(lstm_computations):
        gates = (x @ params["w_ih"] + h @ params["w_hh"]
                 + params["b_ih"][0] + params["b_hh"][0])
        i_g = jax.nn.sigmoid(gates[:, 0 * M:1 * M])
        f_g = jax.nn.sigmoid(gates[:, 1 * M:2 * M])
        g_g = jnp.tanh(gates[:, 2 * M:3 * M])
        o_g = jax.nn.sigmoid(gates[:, 3 * M:4 * M])
        c = f_g * c + i_g * g_g
        query = o_g * jnp.tanh(c)
        energies = jnp.sum(query[:, None, :] * memory, axis=-1)
        attention = jax.nn.softmax(energies + energy_mask, axis=1)
        read = jnp.sum(attention[:, :, None] * memory, axis=1)
        h = query
        x = read
    return jnp.concatenate([query, read], axis=1)


# ----------------------------------------------------------------------------
# Main
# ----------------------------------------------------------------------------
if __name__ == "__main__":
    node_features = 4
    hidden_node_features = 8
    memory_size = 32
    lstm_computations = 3
    B, N = 2, 8
    F = node_features + hidden_node_features

    key = jax.random.PRNGKey(0)
    ks = jax.random.split(key, 8)

    # Deterministic synthetic parameters (shapes follow the torch module;
    # stored pre-transposed so kernels/reference do x @ W; gate order i,f,g,o).
    params = {
        "w_emb": 0.1 * jax.random.normal(ks[0], (F, memory_size), jnp.float32),
        "b_emb": 0.1 * jax.random.normal(ks[1], (1, memory_size), jnp.float32),
        "w_ih":  0.1 * jax.random.normal(ks[2], (memory_size, 4 * memory_size), jnp.float32),
        "w_hh":  0.1 * jax.random.normal(ks[3], (memory_size, 4 * memory_size), jnp.float32),
        "b_ih":  0.1 * jax.random.normal(ks[4], (1, 4 * memory_size), jnp.float32),
        "b_hh":  0.1 * jax.random.normal(ks[5], (1, 4 * memory_size), jnp.float32),
    }

    hidden_output_nodes = jax.random.normal(ks[6], (B, N, hidden_node_features), jnp.float32)
    input_nodes = jax.random.normal(ks[7], (B, N, node_features), jnp.float32)
    node_mask = jnp.array(
        [[True] * N,
         [True, True, True, True, True, False, False, False]], dtype=jnp.bool_)

    out = set2vec_forward(hidden_output_nodes, input_nodes, node_mask, params,
                          lstm_computations=lstm_computations,
                          memory_size=memory_size)
    out = jax.block_until_ready(out)

    ref = set2vec_reference(hidden_output_nodes, input_nodes, node_mask, params,
                            lstm_computations=lstm_computations,
                            memory_size=memory_size)
    assert out.shape == (B, 2 * memory_size)
    assert jnp.allclose(out, ref, rtol=1e-3, atol=1e-3), "mismatch vs reference"

    print("KERNEL_OK")
</pallas_src>

<mosaic_0001>
module attributes {stable_mosaic.version = 11 : i64} {
  func.func @set2vec_kernel(%arg0: memref<16x16xf32, #tpu.memory_space<vmem>>, %arg1: memref<2x16xf32, #tpu.memory_space<vmem>>, %arg2: memref<88x128xf32, #tpu.memory_space<vmem>>, %arg3: memref<2x64xf32, #tpu.memory_space<vmem>>) attributes {dimension_semantics = [], scalar_prefetch = 0 : i64, scratch_operands = 0 : i64, tpu.core_type = #tpu.core_type<tc>} {
    %c0 = arith.constant 0 : index
    %c0_0 = arith.constant 0 : index
    %0 = vector.load %arg2[%c0, %c0_0] : memref<88x128xf32, #tpu.memory_space<vmem>>, vector<16x32xf32>
    %c16 = arith.constant 16 : index
    %c0_1 = arith.constant 0 : index
    %1 = vector.load %arg2[%c16, %c0_1] : memref<88x128xf32, #tpu.memory_space<vmem>>, vector<64x128xf32>
    %c80 = arith.constant 80 : index
    %c0_2 = arith.constant 0 : index
    %2 = vector.load %arg2[%c80, %c0_2] : memref<88x128xf32, #tpu.memory_space<vmem>>, vector<1x128xf32>
    %c0_3 = arith.constant 0 : index
    %c0_4 = arith.constant 0 : index
    %3 = vector.load %arg1[%c0_3, %c0_4] : memref<2x16xf32, #tpu.memory_space<vmem>>, vector<2x16xf32>
    %c0_5 = arith.constant 0 : index
    %c0_6 = arith.constant 0 : index
    %4 = vector.load %arg0[%c0_5, %c0_6] : memref<16x16xf32, #tpu.memory_space<vmem>>, vector<16x16xf32>
    %cst = arith.constant dense<0.000000e+00> : vector<16x32xf32>
    %5 = tpu.matmul %4, %0, %cst {dimension_numbers = #tpu.dot_dimension_numbers<[1], [0], [0], [1], [0, 0, 1, 1], [], []>} : vector<16x16xf32>, vector<16x32xf32>, vector<16x32xf32> -> vector<16x32xf32>
    %6 = tpu.transpose %5, [1, 0] : vector<16x32xf32> -> vector<32x16xf32>
    %cst_7 = arith.constant 0.000000e+00 : f32
    %7 = vector.broadcast %cst_7 : f32 to vector<2x32xf32>
    %cst_8 = arith.constant 0.000000e+00 : f32
    %8 = vector.broadcast %cst_8 : f32 to vector<2x32xf32>
    %cst_9 = arith.constant 0.000000e+00 : f32
    %9 = vector.broadcast %cst_9 : f32 to vector<2x32xf32>
    %10 = tpu.concatenate %9, %7 in 1 : vector<2x32xf32>, vector<2x32xf32> -> vector<2x64xf32>
    %cst_10 = arith.constant dense<0.000000e+00> : vector<2x128xf32>
    %11 = tpu.matmul %10, %1, %cst_10 {dimension_numbers = #tpu.dot_dimension_numbers<[1], [0], [0], [1], [0, 0, 1, 1], [], []>} : vector<2x64xf32>, vector<64x128xf32>, vector<2x128xf32> -> vector<2x128xf32>
    %12 = vector.broadcast %2 : vector<1x128xf32> to vector<2x128xf32>
    %13 = arith.addf %11, %12 : vector<2x128xf32>
    %14 = vector.extract_strided_slice %13 {offsets = [0, 0], sizes = [2, 32], strides = [1, 1]} : vector<2x128xf32> to vector<2x32xf32>
    %15 = arith.negf %14 : vector<2x32xf32>
    %16 = math.exp %15 : vector<2x32xf32>
    %cst_11 = arith.constant 1.000000e+00 : f32
    %17 = vector.broadcast %cst_11 : f32 to vector<2x32xf32>
    %18 = arith.addf %17, %16 : vector<2x32xf32>
    %19 = arith.divf %17, %18 : vector<2x32xf32>
    %20 = vector.extract_strided_slice %13 {offsets = [0, 32], sizes = [2, 32], strides = [1, 1]} : vector<2x128xf32> to vector<2x32xf32>
    %21 = arith.negf %20 : vector<2x32xf32>
    %22 = math.exp %21 : vector<2x32xf32>
    %cst_12 = arith.constant 1.000000e+00 : f32
    %23 = vector.broadcast %cst_12 : f32 to vector<2x32xf32>
    %24 = arith.addf %23, %22 : vector<2x32xf32>
    %25 = arith.divf %23, %24 : vector<2x32xf32>
    %26 = vector.extract_strided_slice %13 {offsets = [0, 64], sizes = [2, 32], strides = [1, 1]} : vector<2x128xf32> to vector<2x32xf32>
    %27 = math.tanh %26 : vector<2x32xf32>
    %28 = vector.extract_strided_slice %13 {offsets = [0, 96], sizes = [2, 32], strides = [1, 1]} : vector<2x128xf32> to vector<2x32xf32>
    %29 = arith.negf %28 : vector<2x32xf32>
    %30 = math.exp %29 : vector<2x32xf32>
    %cst_13 = arith.constant 1.000000e+00 : f32
    %31 = vector.broadcast %cst_13 : f32 to vector<2x32xf32>
    %32 = arith.addf %31, %30 : vector<2x32xf32>
    %33 = arith.divf %31, %32 : vector<2x32xf32>
    %34 = arith.mulf %25, %8 : vector<2x32xf32>
    %35 = arith.mulf %19, %27 : vector<2x32xf32>
    %36 = arith.addf %34, %35 : vector<2x32xf32>
    %37 = math.tanh %36 : vector<2x32xf32>
    %38 = arith.mulf %33, %37 : vector<2x32xf32>
    %cst_14 = arith.constant dense<0.000000e+00> : vector<2x16xf32>
    %39 = tpu.matmul %38, %6, %cst_14 {dimension_numbers = #tpu.dot_dimension_numbers<[1], [0], [0], [1], [0, 0, 1, 1], [], []>} : vector<2x32xf32>, vector<32x16xf32>, vector<2x16xf32> -> vector<2x16xf32>
    %40 = arith.addf %39, %3 : vector<2x16xf32>
    %cst_15 = arith.constant dense<0xFF800000> : vector<2xf32>
    %41 = vector.multi_reduction <maximumf>, %40, %cst_15 [1] : vector<2x16xf32> to vector<2xf32>
    %42 = vector.shape_cast %41 : vector<2xf32> to vector<2x1xf32>
    %43 = vector.broadcast %42 : vector<2x1xf32> to vector<2x16xf32>
    %44 = arith.subf %40, %43 : vector<2x16xf32>
    %45 = math.exp %44 : vector<2x16xf32>
    %cst_16 = arith.constant dense<0.000000e+00> : vector<2xf32>
    %46 = vector.multi_reduction <add>, %45, %cst_16 [1] : vector<2x16xf32> to vector<2xf32>
    %47 = vector.shape_cast %46 : vector<2xf32> to vector<2x1xf32>
    %48 = vector.broadcast %47 : vector<2x1xf32> to vector<2x16xf32>
    %49 = arith.divf %45, %48 : vector<2x16xf32>
    %cst_17 = arith.constant dense<0.000000e+00> : vector<2x32xf32>
    %50 = tpu.matmul %49, %5, %cst_17 {dimension_numbers = #tpu.dot_dimension_numbers<[1], [0], [0], [1], [0, 0, 1, 1], [], []>} : vector<2x16xf32>, vector<16x32xf32>, vector<2x32xf32> -> vector<2x32xf32>
    %51 = tpu.concatenate %50, %38 in 1 : vector<2x32xf32>, vector<2x32xf32> -> vector<2x64xf32>
    %cst_18 = arith.constant dense<0.000000e+00> : vector<2x128xf32>
    %52 = tpu.matmul %51, %1, %cst_18 {dimension_numbers = #tpu.dot_dimension_numbers<[1], [0], [0], [1], [0, 0, 1, 1], [], []>} : vector<2x64xf32>, vector<64x128xf32>, vector<2x128xf32> -> vector<2x128xf32>
    %53 = vector.broadcast %2 : vector<1x128xf32> to vector<2x128xf32>
    %54 = arith.addf %52, %53 : vector<2x128xf32>
    %55 = vector.extract_strided_slice %54 {offsets = [0, 0], sizes = [2, 32], strides = [1, 1]} : vector<2x128xf32> to vector<2x32xf32>
    %56 = arith.negf %55 : vector<2x32xf32>
    %57 = math.exp %56 : vector<2x32xf32>
    %cst_19 = arith.constant 1.000000e+00 : f32
    %58 = vector.broadcast %cst_19 : f32 to vector<2x32xf32>
    %59 = arith.addf %58, %57 : vector<2x32xf32>
    %60 = arith.divf %58, %59 : vector<2x32xf32>
    %61 = vector.extract_strided_slice %54 {offsets = [0, 32], sizes = [2, 32], strides = [1, 1]} : vector<2x128xf32> to vector<2x32xf32>
    %62 = arith.negf %61 : vector<2x32xf32>
    %63 = math.exp %62 : vector<2x32xf32>
    %cst_20 = arith.constant 1.000000e+00 : f32
    %64 = vector.broadcast %cst_20 : f32 to vector<2x32xf32>
    %65 = arith.addf %64, %63 : vector<2x32xf32>
    %66 = arith.divf %64, %65 : vector<2x32xf32>
    %67 = vector.extract_strided_slice %54 {offsets = [0, 64], sizes = [2, 32], strides = [1, 1]} : vector<2x128xf32> to vector<2x32xf32>
    %68 = math.tanh %67 : vector<2x32xf32>
    %69 = vector.extract_strided_slice %54 {offsets = [0, 96], sizes = [2, 32], strides = [1, 1]} : vector<2x128xf32> to vector<2x32xf32>
    %70 = arith.negf %69 : vector<2x32xf32>
    %71 = math.exp %70 : vector<2x32xf32>
    %cst_21 = arith.constant 1.000000e+00 : f32
    %72 = vector.broadcast %cst_21 : f32 to vector<2x32xf32>
    %73 = arith.addf %72, %71 : vector<2x32xf32>
    %74 = arith.divf %72, %73 : vector<2x32xf32>
    %75 = arith.mulf %66, %36 : vector<2x32xf32>
    %76 = arith.mulf %60, %68 : vector<2x32xf32>
    %77 = arith.addf %75, %76 : vector<2x32xf32>
    %78 = math.tanh %77 : vector<2x32xf32>
    %79 = arith.mulf %74, %78 : vector<2x32xf32>
    %cst_22 = arith.constant dense<0.000000e+00> : vector<2x16xf32>
    %80 = tpu.matmul %79, %6, %cst_22 {dimension_numbers = #tpu.dot_dimension_numbers<[1], [0], [0], [1], [0, 0, 1, 1], [], []>} : vector<2x32xf32>, vector<32x16xf32>, vector<2x16xf32> -> vector<2x16xf32>
    %81 = arith.addf %80, %3 : vector<2x16xf32>
    %cst_23 = arith.constant dense<0xFF800000> : vector<2xf32>
    %82 = vector.multi_reduction <maximumf>, %81, %cst_23 [1] : vector<2x16xf32> to vector<2xf32>
    %83 = vector.shape_cast %82 : vector<2xf32> to vector<2x1xf32>
    %84 = vector.broadcast %83 : vector<2x1xf32> to vector<2x16xf32>
    %85 = arith.subf %81, %84 : vector<2x16xf32>
    %86 = math.exp %85 : vector<2x16xf32>
    %cst_24 = arith.constant dense<0.000000e+00> : vector<2xf32>
    %87 = vector.multi_reduction <add>, %86, %cst_24 [1] : vector<2x16xf32> to vector<2xf32>
    %88 = vector.shape_cast %87 : vector<2xf32> to vector<2x1xf32>
    %89 = vector.broadcast %88 : vector<2x1xf32> to vector<2x16xf32>
    %90 = arith.divf %86, %89 : vector<2x16xf32>
    %cst_25 = arith.constant dense<0.000000e+00> : vector<2x32xf32>
    %91 = tpu.matmul %90, %5, %cst_25 {dimension_numbers = #tpu.dot_dimension_numbers<[1], [0], [0], [1], [0, 0, 1, 1], [], []>} : vector<2x16xf32>, vector<16x32xf32>, vector<2x32xf32> -> vector<2x32xf32>
    %92 = tpu.concatenate %91, %79 in 1 : vector<2x32xf32>, vector<2x32xf32> -> vector<2x64xf32>
    %cst_26 = arith.constant dense<0.000000e+00> : vector<2x128xf32>
    %93 = tpu.matmul %92, %1, %cst_26 {dimension_numbers = #tpu.dot_dimension_numbers<[1], [0], [0], [1], [0, 0, 1, 1], [], []>} : vector<2x64xf32>, vector<64x128xf32>, vector<2x128xf32> -> vector<2x128xf32>
    %94 = vector.broadcast %2 : vector<1x128xf32> to vector<2x128xf32>
    %95 = arith.addf %93, %94 : vector<2x128xf32>
    %96 = vector.extract_strided_slice %95 {offsets = [0, 0], sizes = [2, 32], strides = [1, 1]} : vector<2x128xf32> to vector<2x32xf32>
    %97 = arith.negf %96 : vector<2x32xf32>
    %98 = math.exp %97 : vector<2x32xf32>
    %cst_27 = arith.constant 1.000000e+00 : f32
    %99 = vector.broadcast %cst_27 : f32 to vector<2x32xf32>
    %100 = arith.addf %99, %98 : vector<2x32xf32>
    %101 = arith.divf %99, %100 : vector<2x32xf32>
    %102 = vector.extract_strided_slice %95 {offsets = [0, 32], sizes = [2, 32], strides = [1, 1]} : vector<2x128xf32> to vector<2x32xf32>
    %103 = arith.negf %102 : vector<2x32xf32>
    %104 = math.exp %103 : vector<2x32xf32>
    %cst_28 = arith.constant 1.000000e+00 : f32
    %105 = vector.broadcast %cst_28 : f32 to vector<2x32xf32>
    %106 = arith.addf %105, %104 : vector<2x32xf32>
    %107 = arith.divf %105, %106 : vector<2x32xf32>
    %108 = vector.extract_strided_slice %95 {offsets = [0, 64], sizes = [2, 32], strides = [1, 1]} : vector<2x128xf32> to vector<2x32xf32>
    %109 = math.tanh %108 : vector<2x32xf32>
    %110 = vector.extract_strided_slice %95 {offsets = [0, 96], sizes = [2, 32], strides = [1, 1]} : vector<2x128xf32> to vector<2x32xf32>
    %111 = arith.negf %110 : vector<2x32xf32>
    %112 = math.exp %111 : vector<2x32xf32>
    %cst_29 = arith.constant 1.000000e+00 : f32
    %113 = vector.broadcast %cst_29 : f32 to vector<2x32xf32>
    %114 = arith.addf %113, %112 : vector<2x32xf32>
    %115 = arith.divf %113, %114 : vector<2x32xf32>
    %116 = arith.mulf %107, %77 : vector<2x32xf32>
    %117 = arith.mulf %101, %109 : vector<2x32xf32>
    %118 = arith.addf %116, %117 : vector<2x32xf32>
    %119 = math.tanh %118 : vector<2x32xf32>
    %120 = arith.mulf %115, %119 : vector<2x32xf32>
    %cst_30 = arith.constant dense<0.000000e+00> : vector<2x16xf32>
    %121 = tpu.matmul %120, %6, %cst_30 {dimension_numbers = #tpu.dot_dimension_numbers<[1], [0], [0], [1], [0, 0, 1, 1], [], []>} : vector<2x32xf32>, vector<32x16xf32>, vector<2x16xf32> -> vector<2x16xf32>
    %122 = arith.addf %121, %3 : vector<2x16xf32>
    %cst_31 = arith.constant dense<0xFF800000> : vector<2xf32>
    %123 = vector.multi_reduction <maximumf>, %122, %cst_31 [1] : vector<2x16xf32> to vector<2xf32>
    %124 = vector.shape_cast %123 : vector<2xf32> to vector<2x1xf32>
    %125 = vector.broadcast %124 : vector<2x1xf32> to vector<2x16xf32>
    %126 = arith.subf %122, %125 : vector<2x16xf32>
    %127 = math.exp %126 : vector<2x16xf32>
    %cst_32 = arith.constant dense<0.000000e+00> : vector<2xf32>
    %128 = vector.multi_reduction <add>, %127, %cst_32 [1] : vector<2x16xf32> to vector<2xf32>
    %129 = vector.shape_cast %128 : vector<2xf32> to vector<2x1xf32>
    %130 = vector.broadcast %129 : vector<2x1xf32> to vector<2x16xf32>
    %131 = arith.divf %127, %130 : vector<2x16xf32>
    %cst_33 = arith.constant dense<0.000000e+00> : vector<2x32xf32>
    %132 = tpu.matmul %131, %5, %cst_33 {dimension_numbers = #tpu.dot_dimension_numbers<[1], [0], [0], [1], [0, 0, 1, 1], [], []>} : vector<2x16xf32>, vector<16x32xf32>, vector<2x32xf32> -> vector<2x32xf32>
    %133 = tpu.concatenate %120, %132 in 1 : vector<2x32xf32>, vector<2x32xf32> -> vector<2x64xf32>
    %c0_34 = arith.constant 0 : index
    %c0_35 = arith.constant 0 : index
    %134 = vector.load %arg3[%c0_34, %c0_35] : memref<2x64xf32, #tpu.memory_space<vmem>>, vector<2x64xf32>
    tpu.vector_store %arg3[%c0_34, %c0_35], %133 {strides = array<i32>} : memref<2x64xf32, #tpu.memory_space<vmem>>, vector<2x64xf32>,
    return
  }
}

</mosaic_0001>

<bundles_post_ra>
// kernel: tpu_custom_call.1
= control target key start
LH: loop header
LB: loop body
LE: loop exit
PB: predicated region body
PF: predicated region fallthrough
CT: control target
= control target key end

     0   :  { %8 = vsyncpa [#allocation3], 0  ;;  %s1500_s0 = inlined_call_operand.hbm [shape: f32[16,16], index: 0, kind: input, shape index: {}]   ;;  %s1501_s1 = inlined_call_operand.vmem [shape: f32[2,16], index: 1, kind: input, shape index: {}]   ;;  %s1502_s2 = inlined_call_operand.hbm [shape: f32[88,128], index: 2, kind: input, shape index: {}]   ;;  %s1503_s3 = inlined_call_operand.hbm [shape: f32[2,64], index: 3, kind: output, shape index: {}]  }
   0x1   :  { %9 = vsyncpa [#allocation6], 0 }
   0x2   :  { %10 = vsyncpa [#allocation4], 0  ;;  %s1306_s12 = smov [#allocation2]   ;;  %s1234_s16 = scalar_lea.hbm %s1500_s0, 256 }
   0x3   :  { %s16_s13 = sshll.u32 %s1306_s12, 4  ;;  %p1235_p0 = scmp.ne.s32.totalorder %s1500_s0, %s1234_s16  ;;  %s17_s13 = int_to_ptr.vmem [resolvable:$true] %s16_s13 }
   0x4   :  { %p1238_p1 = scmp.lt.u32.totalorder %s1234_s16, %s1500_s0 }
   0x6   :  { %p1240_p2 = pnand %p1238_p1, %p1235_p0 }
   0x8   :  { %1243 = shalt.err (!%p1240_p2)
}
   0x9   :  { %s1244_s21 = scalar_lea.vmem %s17_s13, 256  ;;  %p1249_p4 = scmp.lt.s32.totalorder %s17_s13, %s17_s13 }
   0xa   :  { %p1245_p3 = scmp.ne.s32.totalorder %s17_s13, %s1244_s21  ;;  %p1250_p5 = scmp.lt.s32.totalorder %s1244_s21, %s1244_s21 }
   0xc   :  { %p1251_p6 = por %p1250_p5, %p1249_p4 }
   0xe   :  { %p1252_p7 = pnand %p1251_p6, %p1245_p3 }
  0x10   :  { %1255 = shalt.err (!%p1252_p7)
}
  0x11   :  { %s1307_s22 = smov 128   ;;  %s1308_s23 = smov 8  }
  0x12   :  { %22 = dma.hbm_to_vmem [thread:$0]  %s1500_s0, 256, %s17_s13, [#allocation3], %s1307_s22, %s1307_s22, %s1308_s23  }
  0x13   :  { %s1309_s26 = smov [#allocation5]   ;;  %s1256_s30 = scalar_lea.hbm %s1502_s2, 1408 }
  0x14   :  { %s30_s27 = sshll.u32 %s1309_s26, 4  ;;  %p1257_p8 = scmp.ne.s32.totalorder %s1502_s2, %s1256_s30  ;;  %s31_s27 = int_to_ptr.vmem [resolvable:$true] %s30_s27 }
  0x15   :  { %p1260_p9 = scmp.lt.u32.totalorder %s1256_s30, %s1502_s2 }
  0x17   :  { %p1262_p10 = pnand %p1260_p9, %p1257_p8 }
  0x19   :  { %1265 = shalt.err (!%p1262_p10)
}
  0x1a   :  { %s1266_s8 = scalar_lea.vmem %s31_s27, 1408  ;;  %p1271_p12 = scmp.lt.s32.totalorder %s31_s27, %s31_s27 }
  0x1b   :  { %p1267_p11 = scmp.ne.s32.totalorder %s31_s27, %s1266_s8  ;;  %p1272_p13 = scmp.lt.s32.totalorder %s1266_s8, %s1266_s8 }
  0x1d   :  { %p1273_p0 = por %p1272_p13, %p1271_p12 }
  0x1f   :  { %p1274_p1 = pnand %p1273_p0, %p1267_p11 }
  0x21   :  { %1277 = shalt.err (!%p1274_p1)
}
  0x22   :  { %36 = dma.hbm_to_vmem [thread:$0]  %s1502_s2, 1408, %s31_s27, [#allocation6], %s1307_s22, %s1307_s22, %s1308_s23  }
  0x23   :  { %1300 = dma.done.wait [#allocation3], 256  }
  0x24   :  { %1301 = vsyncadd [#allocation3], 4294967040 }
  0x25   :  { %1302 = dma.done.wait [#allocation6], 1408  }
  0x26   :  { %1303 = vsyncadd [#allocation6], 4294965888  ;;  %v1310_v0 = vmov 0.0|0.0   ;;  %vm1311_vm0 = vmmov 0   ;;  %v1312_v1 = vmov 0.0   ;;  %v45_v2 = vld [vmem:[#allocation5 + $0x10] sm:$0xff] }
  0x27   :  { %1131 = vmatprep.subr.bf16.mxu1 %v1310_v0  ;;  %1044 = vmatprep.mubr.msk.f32.mxu1 %vm1311_vm0, %v1312_v1  ;;  %v46_v3 = vld [vmem:[#allocation5 + $0x18] sm:$0xff]  ;;  %v47_v4 = vld [vmem:[#allocation5 + $0x20] sm:$0xff]  ;;  %v48_v6 = vld [vmem:[#allocation5 + $0x28] sm:$0xff]  ;;  %s1313_s2 = smov 64   ;;  %s1314_s10 = smov 32   ;;  %vm57_vm1 = vcmask 130048  }
  0x28   :  { %v1363_v5 = vpack.c.bf16 %v46_v3, %v45_v2  ;;  %v1366_v7 = vpack.c.bf16 %v48_v6, %v47_v4  ;;  %v49_v8 = vld [vmem:[#allocation5 + $0x30] sm:$0xff]  ;;  %v50_v9 = vld [vmem:[#allocation5 + $0x38] sm:$0xff]  ;;  %v51_v11 = vld [vmem:[#allocation5 + $0x40] sm:$0xff]  ;;  %vm244_vm2 = vcmask 261120   ;;  %vm323_vm4 = vcmask 123904  }
  0x29   :  { %v1370_v10 = vpack.c.bf16 %v50_v9, %v49_v8  ;;  %v52_v12 = vld [vmem:[#allocation5 + $0x48] sm:$0xff]  ;;  %v1382_v14 = vld [vmem:[#allocation5 + $0x50] ss:$0 sm:$0xff]  ;;  %v43_v25 = vld [vmem:[#allocation5] sm:$0xff]  ;;  %vm143_vm5 = vcmask 523264   ;;  %vm934_vm6 = vcmask 517120  }
  0x2a   :  { %1133 = vmatpush3.bf16.msra.mxu1 %v1363_v5  ;;  %v1374_v13 = vpack.c.bf16 %v52_v12, %v51_v11  ;;  %v44_v26 = vld [vmem:[#allocation5 + $0x8] sm:$0xff]  ;;  %v55_v27 = vld [vmem:[#allocation2] sm:$0xff]  ;;  %v56_v29 = vld [vmem:[#allocation2 + $0x8] sm:$0xff] }
  0x2b   :  { %1134 = vmatprep.subr.bf16.mxu1 %v1310_v0  ;;  %v1127_v28 = vpack.c.bf16 %v44_v26, %v43_v25  ;;  %1025 = vmatprep.mubr.msk.f32.mxu0 %vm57_vm1, %v55_v27  ;;  %vm1398_vm3 = vmpackc.low %vm244_vm2, %vm244_vm2  ;;  %v1421_v41 = vld [vmem:[%s1501_s1] sm:$0x3]  ;;  %s1315_s1 = smov [#allocation7]  }
  0x2c   :  { %s942_s13 = sshll.u32 %s1315_s1, 4  ;;  %s943_s13 = int_to_ptr.vmem [resolvable:$true] %s942_s13 }
  0x2d   :  { %1128 = vmatprep.subr.bf16.mxu0 %v1127_v28  ;;  %s1278_s14 = scalar_lea.vmem %s943_s13, 32  ;;  %p1283_p3 = scmp.lt.s32.totalorder %s943_s13, %s943_s13 }
  0x2e   :  { %1136 = vmatpush3.bf16.msra.mxu1 %v1366_v7  ;;  %1130 = vmatpush3.bf16.msra.mxu0 %v1127_v28  ;;  %p1279_p2 = scmp.ne.s32.totalorder %s943_s13, %s1278_s14  ;;  %p1284_p4 = scmp.lt.s32.totalorder %s1278_s14, %s1278_s14 }
  0x2f   :  { %1137 = vmatprep.subr.bf16.mxu1 %v1310_v0  ;;  %1143 = vmatprep.subr.bf16.mxu0 %v1310_v0 }
  0x30   :  { %p1285_p5 = por %p1284_p4, %p1283_p3 }
  0x31   :  { %1026 = vmatmul.mubr.msk.f32.vlgmr.msra.gmra.mrb[0].mxu0 %vm57_vm1, %v56_v29 }
  0x32   :  { %1139 = vmatpush3.bf16.msra.mxu1 %v1370_v10  ;;  %1051 = vmatprep.mubr.msk.f32.mxu0 %vm1311_vm0, %v1312_v1  ;;  %p1286_p6 = pnand %p1285_p5, %p1279_p2 }
  0x33   :  { %1140 = vmatprep.subr.bf16.mxu1 %v1310_v0 }
  0x36   :  { %1142 = vmatpush3.bf16.msra.mxu1 %v1374_v13 }
  0x37   :  { %1162 = vmatprep.subr.bf16.mxu1 %v1310_v0 }
  0x39   :  { %1045 = vmatmul.mubr.f32.vlgmr.msra.gmra.mrb[0].mxu1 %v1312_v1 }
  0x3a   :  { %1084 = vmatprep.mubr.msk.f32.mxu1 %vm1311_vm0, %v1312_v1 }
 0x104   :  { %v1027_v34 = vpop.f32.mrb[0].mxu0 }
 0x105   :  { %v130_v35 = vpop.f32.mrb[1].mxu0 }
 0x106   :  { %v1402_v37 = vpack.c.bf16 %v1027_v34, %v130_v35 }
 0x108   :  { %1146 = vmatpush3.bf16.xpose.msk.msra.mxu0 %vm1398_vm3, %v1402_v37  ;;  %1165 = vmatpush3.bf16.xpose.msk.msra.mxu1 %vm1398_vm3, %v1402_v37 }
 0x109   :  { %1147 = vmatprep.subr.bf16.mxu0 %v1310_v0  ;;  %1166 = vmatprep.subr.bf16.mxu1 %v1310_v0 }
 0x10c   :  { %v213_v15 = vpop.f32.mrb[0].mxu1 }
 0x10d   :  { %v214_v16 = vadd.f32 %v1382_v14, %v213_v15  ;;  %v1046_v17 = vpop.f32.mrb[1].mxu1 }
 0x10f   :  { %1198 = vtanh.f32 %v214_v16  ;;  %v955_v19 = vmul.f32 -1.442695, %v214_v16 }
 0x111   :  { %1200 = vpow2.f32 %v955_v19 }
 0x119   :  { %v1199_v18 = vpop.eup %1198 }
 0x11a   :  { %226 = vrot.lane.b32.xlu0 %v1199_v18, %s1313_s2 }
 0x11b   :  { %v1201_v20 = vpop.eup %1200 }
 0x11c   :  { %v220_v21 = vadd.f32 1.0, %v1201_v20 }
 0x11e   :  { %1202 = vrcp.f32 %v220_v21 }
 0x128   :  { %v1203_v22 = vpop.eup %1202 }
 0x129   :  { %v224_v30 = vmul.f32 0.0, %v1203_v22 }
 0x18c   :  { %v227_v23 = vpop.permute.xlu0 %226 }
 0x18d   :  { %v229_v24 = vmul.f32 %v1203_v22, %v227_v23 }
 0x18f   :  { %231 = vrot.lane.b32.xlu0 %v229_v24, %s1314_s10 }
 0x201   :  { %v232_v31 = vpop.permute.xlu0 %231 }
 0x202   :  { %v1392_v32 = vadd.f32 %v232_v31, %v224_v30 }
 0x204   :  { %1204 = vtanh.f32 %v1392_v32 }
 0x20e   :  { %v1205_v33 = vpop.eup %1204 }
 0x20f   :  { %237 = vrot.lane.b32.xlu1 %v1205_v33, %s1313_s2 }
 0x281   :  { %v238_v38 = vpop.permute.xlu1 %237 }
 0x282   :  { %v240_v39 = vmul.f32 %v1203_v22, %v238_v38 }
 0x284   :  { %242 = vrot.lane.b32.xlu1 %v240_v39, %s1314_s10 }
 0x2f6   :  { %v243_v40 = vpop.permute.xlu1 %242 }
 0x2f7   :  { %1052 = vmatmul.mubr.msk.f32.vlgmr.msra.gmra.mrb[2].mxu0 %vm244_vm2, %v243_v40 }
 0x2f8   :  { %1149 = vmatpush3.bf16.msra.mxu0 %v1402_v37  ;;  %1058 = vmatprep.mubr.msk.f32.mxu0 %vm1311_vm0, %v1312_v1 }
 0x2f9   :  { %1150 = vmatprep.subr.bf16.mxu0 %v1310_v0 }
 0x3ca   :  { %v319_v42 = vpop.f32.mrb[2].mxu0 }
 0x3cb   :  { %v320_v43 = vadd.f32 %v319_v42, %v1421_v41  ;;  %v1053_v44 = vpop.f32.mrb[3].mxu0 }
 0x3cd   :  { %v324_v45 = vsel %vm323_vm4, %v320_v43, -inf }
 0x3ce   :  { %325 = vmax.xlane.f32.xlu0 %v324_v45 }
 0x3e4   :  { %408 = vrot.lane.b32.xlu0 %v240_v39, %s1313_s2 }
 0x45b   :  { %v326_v46 = vpop.xlane.xlu0 %325 }
 0x45c   :  { %v327_v47 = vsub.f32 %v320_v43, %v326_v46 }
 0x45e   :  { %v328_v48 = vmul.f32 1.442695, %v327_v47 }
 0x45f   :  { %v409_v54 = vpop.permute.xlu0 %408 }
 0x460   :  { %1206 = vpow2.f32 %v328_v48 }
 0x46a   :  { %v1207_v49 = vpop.eup %1206 }
 0x46b   :  { %v330_v50 = vsel %vm323_vm4, %v1207_v49, 0.0 }
 0x46c   :  { %331 = vadd.xlane.f32.xlu1 %v330_v50 }
 0x4f9   :  { %v332_v51 = vpop.xlane.xlu1 %331 }
 0x4fa   :  { %1208 = vrcp.f32 %v332_v51 }
 0x504   :  { %v1209_v52 = vpop.eup %1208 }
 0x505   :  { %v334_v53 = vmul.f32 %v1209_v52, %v1207_v49 }
 0x507   :  { %1059 = vmatmul.mubr.msk.f32.vlgmr.msra.gmra.mrb[4].mxu0 %vm57_vm1, %v334_v53 }
 0x508   :  { %1152 = vmatpush3.bf16.msra.mxu0 %v1363_v5  ;;  %1077 = vmatprep.mubr.msk.f32.mxu0 %vm1311_vm0, %v1312_v1 }
 0x509   :  { %1153 = vmatprep.subr.bf16.mxu0 %v1310_v0 }
 0x50c   :  { %1155 = vmatpush3.bf16.msra.mxu0 %v1366_v7 }
 0x50d   :  { %1156 = vmatprep.subr.bf16.mxu0 %v1310_v0 }
 0x510   :  { %1158 = vmatpush3.bf16.msra.mxu0 %v1370_v10 }
 0x511   :  { %1159 = vmatprep.subr.bf16.mxu0 %v1310_v0 }
 0x514   :  { %1161 = vmatpush3.bf16.msra.mxu0 %v1374_v13 }
 0x515   :  { %1181 = vmatprep.subr.bf16.mxu0 %v1310_v0 }
 0x5da   :  { %v404_v55 = vpop.f32.mrb[4].mxu0 }
 0x5db   :  { %v411_v56 = vsel %vm244_vm2, %v404_v55, %v409_v54  ;;  %v1060_v57 = vpop.f32.mrb[5].mxu0 }
 0x5dc   :  { %1078 = vmatmul.mubr.msk.f32.vlgmr.msra.gmra.mrb[6].mxu0 %vm143_vm5, %v411_v56 }
 0x5dd   :  { %1184 = vmatpush3.bf16.xpose.msk.msra.mxu0 %vm1398_vm3, %v1402_v37  ;;  %1117 = vmatprep.mubr.msk.f32.mxu0 %vm1311_vm0, %v1312_v1 }
 0x5de   :  { %1185 = vmatprep.subr.bf16.mxu0 %v1310_v0 }
 0x6af   :  { %v481_v58 = vpop.f32.mrb[6].mxu0 }
 0x6b0   :  { %v482_v59 = vadd.f32 %v1382_v14, %v481_v58  ;;  %v1079_v60 = vpop.f32.mrb[7].mxu0 }
 0x6b2   :  { %1210 = vtanh.f32 %v482_v59  ;;  %v961_v62 = vmul.f32 -1.442695, %v482_v59 }
 0x6b4   :  { %1212 = vpow2.f32 %v961_v62 }
 0x6bc   :  { %v1211_v61 = vpop.eup %1210 }
 0x6bd   :  { %494 = vrot.lane.b32.xlu1 %v1211_v61, %s1313_s2 }
 0x6be   :  { %v1213_v63 = vpop.eup %1212 }
 0x6bf   :  { %v488_v2 = vadd.f32 1.0, %v1213_v63 }
 0x6c1   :  { %1214 = vrcp.f32 %v488_v2 }
 0x6cb   :  { %v1215_v3 = vpop.eup %1214 }
 0x6cc   :  { %v492_v8 = vmul.f32 %v1215_v3, %v1392_v32 }
 0x72f   :  { %v495_v4 = vpop.permute.xlu1 %494 }
 0x730   :  { %v497_v6 = vmul.f32 %v1215_v3, %v495_v4 }
 0x732   :  { %499 = vrot.lane.b32.xlu0 %v497_v6, %s1314_s10 }
 0x7a4   :  { %v500_v9 = vpop.permute.xlu0 %499 }
 0x7a5   :  { %v502_v11 = vadd.f32 %v500_v9, %v492_v8 }
 0x7a7   :  { %1216 = vtanh.f32 %v502_v11 }
 0x7b1   :  { %v1217_v12 = vpop.eup %1216 }
 0x7b2   :  { %505 = vrot.lane.b32.xlu1 %v1217_v12, %s1313_s2 }
 0x824   :  { %v506_v15 = vpop.permute.xlu1 %505 }
 0x825   :  { %v508_v16 = vmul.f32 %v1215_v3, %v506_v15 }
 0x827   :  { %510 = vrot.lane.b32.xlu0 %v508_v16, %s1314_s10 }
 0x899   :  { %v511_v17 = vpop.permute.xlu0 %510 }
 0x89a   :  { %1085 = vmatmul.mubr.msk.f32.vlgmr.msra.gmra.mrb[2].mxu1 %vm244_vm2, %v511_v17 }
 0x89b   :  { %1168 = vmatpush3.bf16.msra.mxu1 %v1402_v37  ;;  %1091 = vmatprep.mubr.msk.f32.mxu1 %vm1311_vm0, %v1312_v1 }
 0x89c   :  { %1169 = vmatprep.subr.bf16.mxu1 %v1310_v0 }
 0x96d   :  { %v580_v18 = vpop.f32.mrb[2].mxu1 }
 0x96e   :  { %v581_v19 = vadd.f32 %v580_v18, %v1421_v41  ;;  %v1086_v20 = vpop.f32.mrb[3].mxu1 }
 0x970   :  { %v584_v21 = vsel %vm323_vm4, %v581_v19, -inf }
 0x971   :  { %585 = vmax.xlane.f32.xlu1 %v584_v21 }
 0x9fe   :  { %v586_v22 = vpop.xlane.xlu1 %585 }
 0x9ff   :  { %v587_v23 = vsub.f32 %v581_v19, %v586_v22 }
 0xa01   :  { %v588_v24 = vmul.f32 1.442695, %v587_v23 }
 0xa03   :  { %1218 = vpow2.f32 %v588_v24 }
 0xa0d   :  { %v1219_v25 = vpop.eup %1218 }
 0xa0e   :  { %v590_v26 = vsel %vm323_vm4, %v1219_v25, 0.0 }
 0xa0f   :  { %591 = vadd.xlane.f32.xlu0 %v590_v26 }
 0xa25   :  { %668 = vrot.lane.b32.xlu0 %v508_v16, %s1313_s2 }
 0xa9c   :  { %v592_v27 = vpop.xlane.xlu0 %591 }
 0xa9d   :  { %1220 = vrcp.f32 %v592_v27 }
 0xaa0   :  { %v669_v30 = vpop.permute.xlu0 %668 }
 0xaa7   :  { %v1221_v28 = vpop.eup %1220 }
 0xaa8   :  { %v594_v29 = vmul.f32 %v1221_v28, %v1219_v25 }
 0xaaa   :  { %1092 = vmatmul.mubr.msk.f32.vlgmr.msra.gmra.mrb[4].mxu1 %vm57_vm1, %v594_v29 }
 0xaab   :  { %1171 = vmatpush3.bf16.msra.mxu1 %v1363_v5  ;;  %1110 = vmatprep.mubr.msk.f32.mxu1 %vm1311_vm0, %v1312_v1 }
 0xaac   :  { %1172 = vmatprep.subr.bf16.mxu1 %v1310_v0 }
 0xaaf   :  { %1174 = vmatpush3.bf16.msra.mxu1 %v1366_v7 }
 0xab0   :  { %1175 = vmatprep.subr.bf16.mxu1 %v1310_v0 }
 0xab3   :  { %1177 = vmatpush3.bf16.msra.mxu1 %v1370_v10 }
 0xab4   :  { %1178 = vmatprep.subr.bf16.mxu1 %v1310_v0 }
 0xab7   :  { %1180 = vmatpush3.bf16.msra.mxu1 %v1374_v13 }
 0xb7d   :  { %v664_v31 = vpop.f32.mrb[4].mxu1 }
 0xb7e   :  { %v671_v32 = vsel %vm244_vm2, %v664_v31, %v669_v30  ;;  %v1093_v5 = vpop.f32.mrb[5].mxu1 }
 0xb7f   :  { %1111 = vmatmul.mubr.msk.f32.vlgmr.msra.gmra.mrb[6].mxu1 %vm143_vm5, %v671_v32 }
 0xc52   :  { %v741_v33 = vpop.f32.mrb[6].mxu1 }
 0xc53   :  { %v742_v34 = vadd.f32 %v1382_v14, %v741_v33  ;;  %v1112_v35 = vpop.f32.mrb[7].mxu1 }
 0xc55   :  { %1222 = vtanh.f32 %v742_v34  ;;  %v967_v10 = vmul.f32 -1.442695, %v742_v34 }
 0xc57   :  { %1224 = vpow2.f32 %v967_v10 }
 0xc5f   :  { %v1223_v7 = vpop.eup %1222 }
 0xc60   :  { %754 = vrot.lane.b32.xlu1 %v1223_v7, %s1313_s2 }
 0xc61   :  { %v1225_v0 = vpop.eup %1224 }
 0xc62   :  { %v748_v36 = vadd.f32 1.0, %v1225_v0 }
 0xc64   :  { %1226 = vrcp.f32 %v748_v36 }
 0xc6e   :  { %v1227_v13 = vpop.eup %1226 }
 0xc6f   :  { %v752_v40 = vmul.f32 %v1227_v13, %v502_v11 }
 0xcd2   :  { %v755_v38 = vpop.permute.xlu1 %754 }
 0xcd3   :  { %v757_v39 = vmul.f32 %v1227_v13, %v755_v38 }
 0xcd5   :  { %759 = vrot.lane.b32.xlu1 %v757_v39, %s1314_s10 }
 0xd47   :  { %v760_v42 = vpop.permute.xlu1 %759 }
 0xd48   :  { %v762_v43 = vadd.f32 %v760_v42, %v752_v40 }
 0xd4a   :  { %1228 = vtanh.f32 %v762_v43 }
 0xd54   :  { %v1229_v14 = vpop.eup %1228 }
 0xd55   :  { %765 = vrot.lane.b32.xlu0 %v1229_v14, %s1313_s2 }
 0xdc7   :  { %v766_v44 = vpop.permute.xlu0 %765 }
 0xdc8   :  { %v768_v45 = vmul.f32 %v1227_v13, %v766_v44 }
 0xdca   :  { %770 = vrot.lane.b32.xlu1 %v768_v45, %s1314_s10 }
 0xe3c   :  { %v771_v46 = vpop.permute.xlu1 %770 }
 0xe3d   :  { %1118 = vmatmul.mubr.msk.f32.vlgmr.msra.gmra.mrb[8].mxu0 %vm244_vm2, %v771_v46 }
 0xe3e   :  { %1187 = vmatpush3.bf16.msra.mxu0 %v1402_v37  ;;  %1124 = vmatprep.mubr.msk.f32.mxu0 %vm1311_vm0, %v1312_v1 }
 0xf10   :  { %v840_v47 = vpop.f32.mrb[8].mxu0 }
 0xf11   :  { %v841_v48 = vadd.f32 %v840_v47, %v1421_v41  ;;  %v1119_v49 = vpop.f32.mrb[9].mxu0 }
 0xf13   :  { %v844_v50 = vsel %vm323_vm4, %v841_v48, -inf }
 0xf14   :  { %845 = vmax.xlane.f32.xlu0 %v844_v50 }
 0xfa1   :  { %v846_v51 = vpop.xlane.xlu0 %845 }
 0xfa2   :  { %v847_v52 = vsub.f32 %v841_v48, %v846_v51 }
 0xfa4   :  { %v848_v53 = vmul.f32 1.442695, %v847_v52 }
 0xfa6   :  { %1230 = vpow2.f32 %v848_v53 }
 0xfb0   :  { %v1231_v54 = vpop.eup %1230 }
 0xfb1   :  { %v850_v55 = vsel %vm323_vm4, %v1231_v54, 0.0 }
 0xfb2   :  { %851 = vadd.xlane.f32.xlu1 %v850_v55 }
0x103f   :  { %v852_v56 = vpop.xlane.xlu1 %851 }
0x1040   :  { %1232 = vrcp.f32 %v852_v56 }
0x104a   :  { %v1233_v37 = vpop.eup %1232 }
0x104b   :  { %v854_v57 = vmul.f32 %v1233_v37, %v1231_v54 }
0x104d   :  { %1125 = vmatmul.mubr.msk.f32.vlgmr.msra.gmra.mrb[10].mxu0 %vm57_vm1, %v854_v57 }
0x1120   :  { %v924_v1 = vpop.f32.mrb[10].mxu0 }
0x1121   :  { %930 = vrot.lane.b32.xlu0 %v924_v1, %s1314_s10  ;;  %v1126_v41 = vpop.f32.mrb[11].mxu0 }
0x1193   :  { %v931_v58 = vpop.permute.xlu0 %930 }
0x1194   :  { %v933_v59 = vsel %vm244_vm2, %v771_v46, %v931_v58 }
0x1195   :  { %935 = vst.msk [vmem:[#allocation7] sm:$0x3] %vm934_vm6, %v933_v59 }
0x1196   :  { %1289 = shalt.err (!%p1286_p6)
}
0x1197   :  { %s1290_s17 = scalar_lea.hbm %s1503_s3, 32 }
0x1198   :  { %p1291_p7 = scmp.ne.s32.totalorder %s1503_s3, %s1290_s17  ;;  %p1294_p8 = scmp.lt.u32.totalorder %s1290_s17, %s1503_s3 }
0x119a   :  { %p1296_p9 = pnand %p1294_p8, %p1291_p7 }
0x119c   :  { %1299 = shalt.err (!%p1296_p9)
}
0x119d   :  { %945 = dma.vmem_to_hbm [thread:$0]  %s943_s13, 32, %s1503_s3, [#allocation4]  }
0x119e   :  { %1304 = dma.done.wait [#allocation4], 32  }
0x119f   :  { %1305 = vsyncadd [#allocation4], 4294967264 }
0x11a0   :  { %949 = vsyncpa [#allocation3], 1 }
0x11a1   :  { %950 = vsyncpa [#allocation6], 1 }
0x11a2   :  { %951 = vsyncpa [#allocation4], 1 }

</bundles_post_ra>
